<compile_context>
chip_gen: v5e
topology: v5e:2x2
jax: 0.10.0
libtpu: 0.0.40
codegen_flags: <defaults>
</compile_context>

<pallas_src>
import functools

import numpy as np

import jax
import jax.numpy as jnp
from jax import lax
from jax.experimental import pallas as pl
from jax.experimental.pallas import tpu as pltpu

WIN_SIZE = 11
WIN_SIGMA = 1.5
K1, K2 = 0.01, 0.03
DATA_RANGE = 1.0          # CombinedLoss calls ssim(..., data_range=1)
CENTER = 0.5              # constant shift (data in [0,1]); exact algebraic identity


def _gauss_win_np(size: int, sigma: float) -> np.ndarray:
    """Same weights as _fspecial_gauss_1d: normalized 1-D Gaussian (float32)."""
    coords = np.arange(size, dtype=np.float32) - (size // 2)
    g = np.exp(-(coords ** 2) / (2.0 * sigma ** 2)).astype(np.float32)
    return (g / g.sum()).astype(np.float32)


def _band_rows(h: int, win: np.ndarray) -> np.ndarray:
    """(hout, h) band matrix: (A @ X)[i, :] = sum_k win[k] * X[i + k, :]."""
    k = win.size
    hout = h - k + 1
    m = np.zeros((hout, h), np.float32)
    for i in range(hout):
        m[i, i:i + k] = win
    return m


def _band_cols_blockdiag(w: int, nblocks: int, win: np.ndarray) -> np.ndarray:
    """(nblocks*w, nblocks*wout) block-diag band: per w-wide lane slab,
    (X @ B)[:, i] = sum_k win[k] * X[:, i + k] (valid correlation on lanes)."""
    k = win.size
    wout = w - k + 1
    m = np.zeros((nblocks * w, nblocks * wout), np.float32)
    for q in range(nblocks):
        for i in range(wout):
            m[q * w + i:q * w + i + k, q * wout + i] = win
    return m


def _blockdiag(m: np.ndarray, k: int) -> np.ndarray:
    r, c = m.shape
    out = np.zeros((k * r, k * c), np.float32)
    for q in range(k):
        out[q * r:(q + 1) * r, q * c:(q + 1) * c] = m
    return out


def _choose_planes_per_step(nc: int, w: int, *, lane_cap: int = 512) -> int:
    """Number of planes packed side-by-side along lanes per grid step.

    * W % 128 == 0: use one plane per step -- the wrapper repack becomes a
      free reshape (no extra HBM transpose pass) and the grid stays long.
    * Otherwise: largest divisor of NC that (a) keeps the grid length >= 2
      whenever NC >= 2 (so the "parallel" grid axis can use both v7x
      TensorCores) and (b) keeps the lane width modest (VMEM / v7x budget).
    """
    if w % 128 == 0:
        return 1
    best = 1
    for p in range(1, nc + 1):
        if nc % p:
            continue
        if p * w > lane_cap:
            break
        if nc >= 2 and nc // p < 2:
            break                      # never collapse the parallel grid to 1
        best = p
    return best


def _combined_loss_kernel(x_ref, y_ref, a5_ref, bw_ref, out_ref, *, hout, c1, c2):
    x = x_ref[0]                         # (H, P*W) lane-packed planes
    y = y_ref[0]

    # ---- MSE partial: sum of squared error over this plane group (VPU) ----
    diff = x - y
    sq_sum = jnp.sum(diff * diff, keepdims=True)            # (1, 1)

    # ---- fused separable "valid" Gaussian filter on the MXU ----------------
    # 0.5-centering is an exact identity (window sums to 1) that conditions
    # the E[x^2] - E[x]^2 cancellation in the sigma terms.
    xc = x - CENTER
    yc = y - CENTER
    # Sublane stack of the 5 quantities: (5*H, P*W).  Each piece is H rows
    # (multiple of 8) -> tile-aligned concatenate, no lane relayout.
    stack = jnp.concatenate([xc, yc, xc * xc, yc * yc, xc * yc], axis=0)

    # Two matmuls total per step.
    # NOTE: lax.Precision.HIGH (review suggestion) is not plumbed through the
    # Mosaic dot_general lowering (only DEFAULT/HIGHEST); keep HIGHEST (exact
    # f32) -- the fused matmuls are tiny so the extra MXU passes are cheap.
    t = jnp.dot(a5_ref[...], stack, preferred_element_type=jnp.float32,
                precision=lax.Precision.HIGHEST)             # (5*hout, P*W)
    r = jnp.dot(t, bw_ref[...], preferred_element_type=jnp.float32,
                precision=lax.Precision.HIGHEST)             # (5*hout, P*wout)

    m1 = r[0 * hout:1 * hout, :]          # = mu1 - 0.5
    m2 = r[1 * hout:2 * hout, :]          # = mu2 - 0.5
    exx = r[2 * hout:3 * hout, :]
    eyy = r[3 * hout:4 * hout, :]
    exy = r[4 * hout:5 * hout, :]

    sigma1_sq = exx - m1 * m1
    sigma2_sq = eyy - m2 * m2
    sigma12 = exy - m1 * m2

    mu1 = m1 + CENTER
    mu2 = m2 + CENTER
    mu1_mu2 = mu1 * mu2
    mu1_sq = mu1 * mu1
    mu2_sq = mu2 * mu2

    # ssim_map = [(2 mu1 mu2 + C1)/(mu1^2+mu2^2+C1)] * [(2 s12 + C2)/(s1+s2+C2)]
    # -> one exact division of the fused numerator / denominator products.
    num = (2.0 * mu1_mu2 + c1) * (2.0 * sigma12 + c2)
    den = (mu1_sq + mu2_sq + c1) * (sigma1_sq + sigma2_sq + c2)
    ssim_map = num / den
    ss_sum = jnp.sum(ssim_map, keepdims=True)                # (1, 1)

    # ---- single lane-dense (8, 128) partial tile per step ------------------
    # sublane 0 = squared-error sum, sublane 1 = ssim-map sum.
    sub = lax.broadcasted_iota(jnp.int32, (8, 128), 0)
    sq_b = jnp.broadcast_to(sq_sum, (8, 128))
    ss_b = jnp.broadcast_to(ss_sum, (8, 128))
    out_ref[0] = jnp.where(sub == 0, sq_b, jnp.where(sub == 1, ss_b, 0.0))


def combined_loss(y_pred, y_true, w1, w2=None):
    """Pallas equivalent of CombinedLoss(w1, w2)(y_pred, y_true)."""
    if w2 is None:
        w2 = 1.0 - w1
    n, c, h, w = y_pred.shape
    # TODO(synk): PyTorch's gaussian_filter silently skips smoothing along a
    # spatial dim smaller than win_size; we require H, W >= win_size instead.
    assert h >= WIN_SIZE and w >= WIN_SIZE, "spatial dims must be >= win_size"
    nc = n * c
    hout = h - WIN_SIZE + 1
    wout = w - WIN_SIZE + 1

    p = _choose_planes_per_step(nc, w)     # planes per grid step
    g = nc // p                            # grid length (independent groups)
    pw = p * w
    pwout = p * wout

    # Lane-dense packed layout (g, H, P*W).  Free reshape when p == 1.
    x = jnp.transpose(
        y_pred.astype(jnp.float32).reshape(g, p, h, w), (0, 2, 1, 3)
    ).reshape(g, h, pw)
    y = jnp.transpose(
        y_true.astype(jnp.float32).reshape(g, p, h, w), (0, 2, 1, 3)
    ).reshape(g, h, pw)

    win = _gauss_win_np(WIN_SIZE, WIN_SIGMA)
    a5 = jnp.asarray(_blockdiag(_band_rows(h, win), 5))       # (5*hout, 5*h)
    bw = jnp.asarray(_band_cols_blockdiag(w, p, win))         # (p*w, p*wout)

    kernel = functools.partial(
        _combined_loss_kernel,
        hout=hout,
        c1=float((K1 * DATA_RANGE) ** 2),
        c2=float((K2 * DATA_RANGE) ** 2))

    # Per-step VMEM: double-buffered x/y blocks + band matrices + stack +
    # filtered temporaries + output tile; clamp to a window that keeps
    # headroom on v7x's 64 MiB physical VMEM.
    step_bytes = 4 * (2 * 2 * h * pw          # x, y blocks (double-buffered)
                      + 2 * (a5.size + bw.size)
                      + 6 * h * pw            # sublane stack + temporaries
                      + 12 * 5 * hout * pwout
                      + 2 * 8 * 128)
    vmem_limit = int(min(32 * 1024 * 1024,
                         max(16 * 1024 * 1024, 2 * step_bytes)))

    parts = pl.pallas_call(
        kernel,
        out_shape=jax.ShapeDtypeStruct((g, 8, 128), jnp.float32),
        grid_spec=pltpu.PrefetchScalarGridSpec(
            num_scalar_prefetch=0,
            grid=(g,),
            in_specs=[
                pl.BlockSpec((1, h, pw), lambda i: (i, 0, 0)),          # x
                pl.BlockSpec((1, h, pw), lambda i: (i, 0, 0)),          # y
                pl.BlockSpec((5 * hout, 5 * h), lambda i: (0, 0)),      # A5 band
                pl.BlockSpec((pw, pwout), lambda i: (0, 0)),            # B_W band
            ],
            out_specs=pl.BlockSpec((1, 8, 128), lambda i: (i, 0, 0)),
        ),
        compiler_params=pltpu.CompilerParams(
            dimension_semantics=("parallel",),
            vmem_limit_bytes=vmem_limit),
    )(x, y, a5, bw)

    # Tiny final combine in plain JAX (keeps the grid axis fully parallel).
    mse = jnp.sum(parts[:, 0, 0]) / float(n * c * h * w)
    ssim_val = jnp.sum(parts[:, 1, 0]) / float(nc * hout * wout)
    return w1 * mse + w2 * (1.0 - ssim_val)


def _reference_combined_loss(y_pred, y_true, w1, w2, win):
    """Pure-JAX reference mirroring the PyTorch math (for validation)."""
    n, c, h, w = y_pred.shape
    mse = jnp.mean((y_pred - y_true) ** 2)
    x = y_pred.reshape(n * c, h, w).astype(jnp.float32)
    y = y_true.reshape(n * c, h, w).astype(jnp.float32)
    hout, wout = h - win.size + 1, w - win.size + 1
    wj = jnp.asarray(win)

    def gfilt(a):
        acc_h = jnp.zeros((a.shape[0], hout, w), jnp.float32)
        for k in range(win.size):
            acc_h = acc_h + wj[k] * a[:, k:k + hout, :]
        acc = jnp.zeros((a.shape[0], hout, wout), jnp.float32)
        for k in range(win.size):
            acc = acc + wj[k] * acc_h[:, :, k:k + wout]
        return acc

    c1 = (K1 * DATA_RANGE) ** 2
    c2 = (K2 * DATA_RANGE) ** 2
    mu1, mu2 = gfilt(x), gfilt(y)
    s1 = gfilt(x * x) - mu1 ** 2
    s2 = gfilt(y * y) - mu2 ** 2
    s12 = gfilt(x * y) - mu1 * mu2
    cs = (2 * s12 + c2) / (s1 + s2 + c2)
    sm = (2 * mu1 * mu2 + c1) / (mu1 ** 2 + mu2 ** 2 + c1) * cs
    return w1 * mse + w2 * (1.0 - jnp.mean(sm))


if __name__ == "__main__":
    key = jax.random.PRNGKey(0)
    k1, k2 = jax.random.split(key)
    N, C, H, W = 2, 4, 16, 16
    y_pred = jax.random.uniform(k1, (N, C, H, W), dtype=jnp.float32)
    y_true = jax.random.uniform(k2, (N, C, H, W), dtype=jnp.float32)

    w1 = 0.6
    w2 = 1.0 - w1

    loss = jax.block_until_ready(combined_loss(y_pred, y_true, w1, w2))

    win = _gauss_win_np(WIN_SIZE, WIN_SIGMA)
    ref = jax.block_until_ready(
        _reference_combined_loss(y_pred, y_true, w1, w2, win))
    assert jnp.allclose(loss, ref, rtol=2e-3, atol=2e-3), (loss, ref)

    print("KERNEL_OK")
</pallas_src>

<mosaic_0001>
module attributes {stable_mosaic.version = 11 : i64} {
  func.func @_combined_loss_kernel(%arg0: i32, %arg1: memref<1x16x64xf32, #tpu.memory_space<vmem>>, %arg2: memref<1x16x64xf32, #tpu.memory_space<vmem>>, %arg3: memref<30x80xf32, #tpu.memory_space<vmem>>, %arg4: memref<64x24xf32, #tpu.memory_space<vmem>>, %arg5: memref<1x8x128xf32, #tpu.memory_space<vmem>>) attributes {dimension_semantics = [#tpu.dimension_semantics<parallel>], iteration_bounds = array<i64: 2>, scalar_prefetch = 0 : i64, scratch_operands = 0 : i64, tpu.core_type = #tpu.core_type<tc>, window_params = [{transform_indices = @transform_0, window_bounds = array<i64: 1, 16, 64>}, {transform_indices = @transform_1, window_bounds = array<i64: 1, 16, 64>}, {pipeline_mode = #tpu.pipeline_mode<synchronous>, transform_indices = @transform_2, window_bounds = array<i64: 30, 80>}, {pipeline_mode = #tpu.pipeline_mode<synchronous>, transform_indices = @transform_3, window_bounds = array<i64: 64, 24>}, {transform_indices = @transform_4, window_bounds = array<i64: 1, 8, 128>}]} {
    %c0 = arith.constant 0 : index
    %c0_0 = arith.constant 0 : index
    %c0_1 = arith.constant 0 : index
    %0 = vector.load %arg1[%c0, %c0_0, %c0_1] : memref<1x16x64xf32, #tpu.memory_space<vmem>>, vector<1x16x64xf32>
    %1 = vector.shape_cast %0 : vector<1x16x64xf32> to vector<16x64xf32>
    %c0_2 = arith.constant 0 : index
    %c0_3 = arith.constant 0 : index
    %c0_4 = arith.constant 0 : index
    %2 = vector.load %arg2[%c0_2, %c0_3, %c0_4] : memref<1x16x64xf32, #tpu.memory_space<vmem>>, vector<1x16x64xf32>
    %3 = vector.shape_cast %2 : vector<1x16x64xf32> to vector<16x64xf32>
    %4 = arith.subf %1, %3 : vector<16x64xf32>
    %5 = arith.mulf %4, %4 : vector<16x64xf32>
    %6 = vector.shape_cast %5 : vector<16x64xf32> to vector<1x16x64xf32>
    %cst = arith.constant dense<0.000000e+00> : vector<1xf32>
    %7 = vector.multi_reduction <add>, %6, %cst [1, 2] : vector<1x16x64xf32> to vector<1xf32>
    %8 = vector.shape_cast %7 : vector<1xf32> to vector<1x1x1xf32>
    %9 = vector.extract %8[0, 0, 0] : f32 from vector<1x1x1xf32>
    %10 = vector.broadcast %9 : f32 to vector<1x1xf32>
    %cst_5 = arith.constant 5.000000e-01 : f32
    %11 = vector.broadcast %cst_5 : f32 to vector<16x64xf32>
    %12 = arith.subf %1, %11 : vector<16x64xf32>
    %cst_6 = arith.constant 5.000000e-01 : f32
    %13 = vector.broadcast %cst_6 : f32 to vector<16x64xf32>
    %14 = arith.subf %3, %13 : vector<16x64xf32>
    %15 = arith.mulf %12, %12 : vector<16x64xf32>
    %16 = arith.mulf %14, %14 : vector<16x64xf32>
    %17 = arith.mulf %12, %14 : vector<16x64xf32>
    %18 = tpu.concatenate %12, %14, %15, %16, %17 in 0 : vector<16x64xf32>, vector<16x64xf32>, vector<16x64xf32>, vector<16x64xf32>, vector<16x64xf32> -> vector<80x64xf32>
    %c0_7 = arith.constant 0 : index
    %c0_8 = arith.constant 0 : index
    %19 = vector.load %arg3[%c0_7, %c0_8] : memref<30x80xf32, #tpu.memory_space<vmem>>, vector<30x80xf32>
    %cst_9 = arith.constant dense<0.000000e+00> : vector<30x64xf32>
    %20 = tpu.matmul %19, %18, %cst_9 {dimension_numbers = #tpu.dot_dimension_numbers<[1], [0], [0], [1], [0, 0, 1, 1], [], []>, precision = #tpu.contract_precision<fp32>} : vector<30x80xf32>, vector<80x64xf32>, vector<30x64xf32> -> vector<30x64xf32>
    %c0_10 = arith.constant 0 : index
    %c0_11 = arith.constant 0 : index
    %21 = vector.load %arg4[%c0_10, %c0_11] : memref<64x24xf32, #tpu.memory_space<vmem>>, vector<64x24xf32>
    %cst_12 = arith.constant dense<0.000000e+00> : vector<30x24xf32>
    %22 = tpu.matmul %20, %21, %cst_12 {dimension_numbers = #tpu.dot_dimension_numbers<[1], [0], [0], [1], [0, 0, 1, 1], [], []>, precision = #tpu.contract_precision<fp32>} : vector<30x64xf32>, vector<64x24xf32>, vector<30x24xf32> -> vector<30x24xf32>
    %23 = vector.extract_strided_slice %22 {offsets = [0, 0], sizes = [6, 24], strides = [1, 1]} : vector<30x24xf32> to vector<6x24xf32>
    %24 = vector.extract_strided_slice %22 {offsets = [6, 0], sizes = [6, 24], strides = [1, 1]} : vector<30x24xf32> to vector<6x24xf32>
    %25 = vector.extract_strided_slice %22 {offsets = [12, 0], sizes = [6, 24], strides = [1, 1]} : vector<30x24xf32> to vector<6x24xf32>
    %26 = vector.extract_strided_slice %22 {offsets = [18, 0], sizes = [6, 24], strides = [1, 1]} : vector<30x24xf32> to vector<6x24xf32>
    %27 = vector.extract_strided_slice %22 {offsets = [24, 0], sizes = [6, 24], strides = [1, 1]} : vector<30x24xf32> to vector<6x24xf32>
    %28 = arith.mulf %23, %23 : vector<6x24xf32>
    %29 = arith.subf %25, %28 : vector<6x24xf32>
    %30 = arith.mulf %24, %24 : vector<6x24xf32>
    %31 = arith.subf %26, %30 : vector<6x24xf32>
    %32 = arith.mulf %23, %24 : vector<6x24xf32>
    %33 = arith.subf %27, %32 : vector<6x24xf32>
    %cst_13 = arith.constant 5.000000e-01 : f32
    %34 = vector.broadcast %cst_13 : f32 to vector<6x24xf32>
    %35 = arith.addf %23, %34 : vector<6x24xf32>
    %cst_14 = arith.constant 5.000000e-01 : f32
    %36 = vector.broadcast %cst_14 : f32 to vector<6x24xf32>
    %37 = arith.addf %24, %36 : vector<6x24xf32>
    %38 = arith.mulf %35, %37 : vector<6x24xf32>
    %39 = arith.mulf %35, %35 : vector<6x24xf32>
    %40 = arith.mulf %37, %37 : vector<6x24xf32>
    %cst_15 = arith.constant 2.000000e+00 : f32
    %41 = vector.broadcast %cst_15 : f32 to vector<6x24xf32>
    %42 = arith.mulf %41, %38 : vector<6x24xf32>
    %cst_16 = arith.constant 9.99999974E-5 : f32
    %43 = vector.broadcast %cst_16 : f32 to vector<6x24xf32>
    %44 = arith.addf %42, %43 : vector<6x24xf32>
    %cst_17 = arith.constant 2.000000e+00 : f32
    %45 = vector.broadcast %cst_17 : f32 to vector<6x24xf32>
    %46 = arith.mulf %45, %33 : vector<6x24xf32>
    %cst_18 = arith.constant 8.99999984E-4 : f32
    %47 = vector.broadcast %cst_18 : f32 to vector<6x24xf32>
    %48 = arith.addf %46, %47 : vector<6x24xf32>
    %49 = arith.mulf %44, %48 : vector<6x24xf32>
    %50 = arith.addf %39, %40 : vector<6x24xf32>
    %cst_19 = arith.constant 9.99999974E-5 : f32
    %51 = vector.broadcast %cst_19 : f32 to vector<6x24xf32>
    %52 = arith.addf %50, %51 : vector<6x24xf32>
    %53 = arith.addf %29, %31 : vector<6x24xf32>
    %cst_20 = arith.constant 8.99999984E-4 : f32
    %54 = vector.broadcast %cst_20 : f32 to vector<6x24xf32>
    %55 = arith.addf %53, %54 : vector<6x24xf32>
    %56 = arith.mulf %52, %55 : vector<6x24xf32>
    %57 = arith.divf %49, %56 : vector<6x24xf32>
    %58 = vector.shape_cast %57 : vector<6x24xf32> to vector<1x6x24xf32>
    %cst_21 = arith.constant dense<0.000000e+00> : vector<1xf32>
    %59 = vector.multi_reduction <add>, %58, %cst_21 [1, 2] : vector<1x6x24xf32> to vector<1xf32>
    %60 = vector.shape_cast %59 : vector<1xf32> to vector<1x1x1xf32>
    %61 = vector.extract %60[0, 0, 0] : f32 from vector<1x1x1xf32>
    %62 = vector.broadcast %61 : f32 to vector<1x1xf32>
    %63 = tpu.iota {dimensions = array<i32: 0>} : vector<8x128xi32>
    %64 = vector.shape_cast %10 : vector<1x1xf32> to vector<1x1xf32>
    %65 = vector.broadcast %64 : vector<1x1xf32> to vector<8x128xf32>
    %66 = vector.shape_cast %62 : vector<1x1xf32> to vector<1x1xf32>
    %67 = vector.broadcast %66 : vector<1x1xf32> to vector<8x128xf32>
    %c0_i32 = arith.constant 0 : i32
    %68 = vector.broadcast %c0_i32 : i32 to vector<8x128xi32>
    %69 = arith.cmpi eq, %63, %68 : vector<8x128xi32>
    %c1_i32 = arith.constant 1 : i32
    %70 = vector.broadcast %c1_i32 : i32 to vector<8x128xi32>
    %71 = arith.cmpi eq, %63, %70 : vector<8x128xi32>
    %cst_22 = arith.constant 0.000000e+00 : f32
    %72 = vector.broadcast %cst_22 : f32 to vector<8x128xf32>
    %73 = arith.select %71, %67, %72 : vector<8x128xi1>, vector<8x128xf32>
    %74 = arith.select %69, %65, %73 : vector<8x128xi1>, vector<8x128xf32>
    %c0_23 = arith.constant 0 : index
    %c0_24 = arith.constant 0 : index
    %c0_25 = arith.constant 0 : index
    %75 = vector.load %arg5[%c0_23, %c0_24, %c0_25] : memref<1x8x128xf32, #tpu.memory_space<vmem>>, vector<1x8x128xf32>
    %76 = vector.shape_cast %75 : vector<1x8x128xf32> to vector<8x128xf32>
    %77 = vector.shape_cast %74 : vector<8x128xf32> to vector<1x8x128xf32>
    tpu.vector_store %arg5[%c0_23, %c0_24, %c0_25], %77 {strides = array<i32>} : memref<1x8x128xf32, #tpu.memory_space<vmem>>, vector<1x8x128xf32>,
    return
  }
  func.func @transform_0(%arg0: i32) -> (i32, i32, i32) {
    %c0_i32 = arith.constant 0 : i32
    %c0_i32_0 = arith.constant 0 : i32
    %c0_i32_1 = arith.constant 0 : i32
    return %arg0, %c0_i32, %c0_i32_0 : i32, i32, i32
  }
  func.func @transform_1(%arg0: i32) -> (i32, i32, i32) {
    %c0_i32 = arith.constant 0 : i32
    %c0_i32_0 = arith.constant 0 : i32
    %c0_i32_1 = arith.constant 0 : i32
    return %arg0, %c0_i32, %c0_i32_0 : i32, i32, i32
  }
  func.func @transform_2(%arg0: i32) -> (i32, i32) {
    %c0_i32 = arith.constant 0 : i32
    %c0_i32_0 = arith.constant 0 : i32
    %c0_i32_1 = arith.constant 0 : i32
    return %c0_i32, %c0_i32_0 : i32, i32
  }
  func.func @transform_3(%arg0: i32) -> (i32, i32) {
    %c0_i32 = arith.constant 0 : i32
    %c0_i32_0 = arith.constant 0 : i32
    %c0_i32_1 = arith.constant 0 : i32
    return %c0_i32, %c0_i32_0 : i32, i32
  }
  func.func @transform_4(%arg0: i32) -> (i32, i32, i32) {
    %c0_i32 = arith.constant 0 : i32
    %c0_i32_0 = arith.constant 0 : i32
    %c0_i32_1 = arith.constant 0 : i32
    return %arg0, %c0_i32, %c0_i32_0 : i32, i32, i32
  }
}

</mosaic_0001>

<bundles_post_ra>
// kernel: tpu_custom_call.1
= control target key start
LH: loop header
LB: loop body
LE: loop exit
PB: predicated region body
PF: predicated region fallthrough
CT: control target
= control target key end

     0   :  { %9 = vsyncpa [#allocation3], 0  ;;  %s1788_s0 = inlined_call_operand.vmem [shape: f32[2,16,64], index: 0, kind: input, shape index: {}]   ;;  %s1789_s1 = inlined_call_operand.vmem [shape: f32[2,16,64], index: 1, kind: input, shape index: {}]   ;;  %s1790_s2 = inlined_call_operand.hbm [shape: f32[30,80], index: 2, kind: input, shape index: {}]   ;;  %s1791_s3 = inlined_call_operand.vmem [shape: f32[64,24], index: 3, kind: input, shape index: {}]   ;;  %s1792_s4 = inlined_call_operand.hbm [shape: f32[2,8,128], index: 4, kind: output, shape index: {}]  }
   0x1   :  { %10 = vsyncpa [#allocation4], 0 }
   0x2   :  { %12 = vsyncpa [#allocation4 + $0x1], 0  ;;  %s1386_s15 = smov 0   ;;  %s1388_s16 = smov 0  }
   0x3   :  { %s1390_s17 = smov 0   ;;  %s1392_s18 = smov 0  }
   0x4 LB: > { %s1407_s19 = sadd.s32 4294967295, %s1356_s18   ;;  %s1181_s20 = sadd.s32 4294967294, %s1356_s18   ;;  %s1356_s18 = sphi %s1392_s18, %s1798_s18   ;;  %s1352_s17 = sphi %s1390_s17, %s1797_s17   ;;  %s1348_s16 = sphi %s1388_s16, %s1796_s16   ;;  %s1344_s15 = sphi %s1386_s15, %s1795_s15  }
   0x5   : > { %s1411_s21 = sadd.s32 1, %s1356_s18   ;;  %s119_s22 = sadd.s32 1, %s1352_s17 }
   0x6   : > { %s116_s23 = ssub.s32 %s1356_s18, %s1411_s21  ;;  %p129_p0 = scmp.ne.s32.totalorder %s1352_s17, %s1348_s16 }
   0x7   : > { %p117_p1 = scmp.eq.s32.totalorder %s116_s23, 0  ;;  %p130_p2 = scmp.eq.s32.totalorder %s1407_s19, 1 }
   0x8   : > { %p135_p3 = scmp.ne.s32.totalorder %s1348_s16, %s1344_s15  ;;  %p136_p4 = scmp.eq.s32.totalorder %s1181_s20, 1 }
   0x9   : > { %s1422_s24 = scalar_select %p117_p1, %s1352_s17, %s119_s22  }
   0xa   : > { %p1424_p5 = por %p130_p2, %p129_p0  ;;  %p1428_p6 = por %p136_p4, %p135_p3 }
   0xb   : > { %p1182_p7 = scmp.ge.s32.totalorder %s1356_s18, 1  ;;  %p143_p8 = scmp.lt.s32.totalorder %s1356_s18, 3 }
   0xc   : > { %p1220_p9 = scmp.eq.s32.totalorder %s1407_s19, 0  ;;  %s154_s29 = sshll.u32 %s1790_s2, 4  ;;  %s155_s29 = int_to_ptr.hbm [resolvable:$true] %s154_s29 }
   0xd   : > { %p144_p10 = pnand %p1182_p7, %p143_p8  ;;  %s1358_s30 = smov [#allocation2]  }
   0xe   : > { %s156_s5 = sshll.u32 %s1358_s30, 4  ;;  %s1359_s6 = smov 128   ;;  %s157_s5 = int_to_ptr.vmem [resolvable:$true] %s156_s5 }
   0xf   : > { %p1212_p11 = pneg %p144_p10  ;;  %s1360_s7 = smov 8  }
  0x10   : > { %191 = sbr.rel (%p144_p10) target bundleno = 635 (0x27b), region = 36 }
  0x11   : > { %p1213_p12 = pnand %p1220_p9, %p1212_p11 }
  0x13   : > { %1215 = dma.hbm_to_vmem [thread:$0]  (!%p1213_p12), %s155_s29, 512, %s157_s5, [#allocation3], %s1359_s6, %s1359_s6, %s1360_s7  }
  0x15   : > { %1335 = dma.done.wait (%p1220_p9), [#allocation3], 512  }
  0x16   : > { %1337 = vsyncadd (%p1220_p9), [#allocation3], 4294966784  ;;  %p223_p13 = scmp.lt.s32.totalorder %s1407_s19, 1  ;;  %vm268_vm0 = vcmask 654336   ;;  %v264_v12 = vld [vmem:[#allocation2] sm:$0xff]  ;;  %v265_v33 = vld [vmem:[#allocation2 + $0x8] sm:$0xff] }
  0x17   : > { %v270_v21 = vsel %vm268_vm0, %v264_v12, 0  ;;  %v273_v44 = vsel %vm268_vm0, %v265_v33, 0  ;;  %v266_v56 = vld [vmem:[#allocation2 + $0x10] sm:$0xff]  ;;  %vm241_vm1 = vcmask 523264   ;;  %vm995_vm2 = vcmask 1043456   ;;  %s1197_s23 = sshll.u32 %s1407_s19, 3 }
  0x18   : > { %s224_s8 = scalar_select %p223_p13, %s1407_s19, 1  ;;  %v1515_v32 = vand.u32 4294901760, %v270_v21  ;;  %v1568_v55 = vand.u32 4294901760, %v273_v44  ;;  %vm1002_vm3 = vcmask 1041408   ;;  %vm1062_vm8 = vcmask 193536  }
  0x19   : > { %s1093_s29 = scalar_lea.hbm %s1792_s4, %s1197_s23  ;;  %s1310_s13 = scalar_lea.hbm %s1792_s4, 16 }
  0x1a   : > { %s1200_s9 = sshll.u32 %s224_s8, 4  ;;  %v1543_v43 = vsub.f32 %v270_v21, %v1515_v32  ;;  %v316_v62 = vsub.f32 %v273_v44, %v1568_v55  ;;  %v267_v21 = vld [vmem:[#allocation2 + $0x18] sm:$0x3f]  ;;  %s1097_s7 = sshll.u32 %s1093_s29, 4  ;;  %s1098_s7 = int_to_ptr.hbm [resolvable:$true] %s1097_s7 }
  0x1b   : > { %s227_s12 = scalar_lea.vmem %s1788_s0, %s1200_s9  ;;  %s232_s20 = scalar_lea.vmem %s1789_s1, %s1200_s9 }
  0x1c   : > { %v1452_v0 = vld [vmem:[%s227_s12 + $0x8] sm:$0xff]  ;;  %v1456_v2 = vld [vmem:[%s227_s12] sm:$0xff]  ;;  %v309_v50 = vand.u32 4294901760, %v1543_v43  ;;  %s1304_s9 = sshra.s32 %s1098_s7, 4  ;;  %s1305_s9 = int_to_ptr.hbm [resolvable:$true] %s1304_s9 }
  0x1d   : > { %v1454_v1 = vld [vmem:[%s232_s20 + $0x8] sm:$0xff]  ;;  %v1459_v3 = vadd.f32 -0.5, %v1452_v0  ;;  %v1462_v5 = vld [vmem:[%s232_s20] sm:$0xff]  ;;  %v1465_v6 = vadd.f32 -0.5, %v1456_v2  ;;  %s220_s20 = sand.u32 1, %s1348_s16   ;;  %s1306_s10 = scalar_lea.hbm %s1305_s9, 8 }
  0x1e   : > { %v1195_v4 = vadd.f32 -0.5, %v1454_v1  ;;  %v1194_v7 = vadd.f32 -0.5, %v1462_v5  ;;  %v310_v61 = vsub.f32 %v1543_v43, %v309_v50  ;;  %s1187_s22 = sshll.u32 %s220_s20, 3  ;;  %s1083_s19 = scalar_lea.sflag [#allocation4], %s220_s20 }
  0x1f   : > { %v259_v10 = vmul.f32 %v1459_v3, %v1459_v3  ;;  %v258_v11 = vmul.f32 %v1465_v6, %v1465_v6  ;;  %v1521_v36 = vand.u32 4294901760, %v1459_v3  ;;  %v1540_v42 = vand.u32 4294901760, %v1465_v6  ;;  %s222_s30 = scalar_lea.vmem [#allocation5], %s1187_s22  ;;  %p1307_p0 = scmp.ne.s32.totalorder %s1305_s9, %s1306_s10 }
  0x20   : > { %v263_v8 = vmul.f32 %v1195_v4, %v1459_v3  ;;  %v261_v9 = vmul.f32 %v1195_v4, %v1195_v4  ;;  %v262_v13 = vmul.f32 %v1194_v7, %v1465_v6  ;;  %v260_v14 = vmul.f32 %v1194_v7, %v1194_v7  ;;  %s1095_s5 = sshll.u32 %s222_s30, 4  ;;  %p1311_p3 = scmp.lt.s32.totalorder %s1305_s9, %s1792_s4  ;;  %s1096_s5 = int_to_ptr.vmem [resolvable:$true] %s1095_s5 }
  0x21   : > { %v1478_v17 = vand.u32 4294901760, %v259_v10  ;;  %v1480_v18 = vand.u32 4294901760, %v258_v11  ;;  %v1495_v24 = vand.u32 4294901760, %v1195_v4  ;;  %v1506_v28 = vand.u32 4294901760, %v1194_v7  ;;  %p1308_p1 = pnand %p1307_p0, %p1424_p5  ;;  %p1312_p4 = scmp.lt.s32.totalorder %s1310_s13, %s1306_s10 }
  0x22   : > { %v1474_v15 = vand.u32 4294901760, %v263_v8  ;;  %v1476_v16 = vand.u32 4294901760, %v261_v9  ;;  %v1482_v19 = vand.u32 4294901760, %v262_v13  ;;  %v1484_v20 = vand.u32 4294901760, %v260_v14 }
  0x23   : > { %v1498_v25 = vsub.f32 %v259_v10, %v1478_v17  ;;  %v1513_v31 = vsub.f32 %v258_v11, %v1480_v18  ;;  %v1533_v40 = vsub.f32 %v1195_v4, %v1495_v24  ;;  %v1553_v48 = vsub.f32 %v1194_v7, %v1506_v28  ;;  %p1309_p2 = pneg %p1308_p1  ;;  %p1313_p7 = por %p1312_p4, %p1311_p3 }
  0x24   : > { %288 = vmatpush.msra.mxu0 %v1474_v15  ;;  %v1489_v22 = vsub.f32 %v263_v8, %v1474_v15  ;;  %487 = vmatpush.msra.mxu3 %v1474_v15  ;;  %v1493_v23 = vsub.f32 %v261_v9, %v1476_v16  ;;  %v1501_v26 = vsub.f32 %v262_v13, %v1482_v19  ;;  %v311_v10 = vand.u32 4294901760, %v310_v61 }
  0x25   : > { %v1504_v27 = vsub.f32 %v260_v14, %v1484_v20  ;;  %v372_v39 = vand.u32 4294901760, %v1498_v25  ;;  %v378_v47 = vand.u32 4294901760, %v1513_v31  ;;  %v384_v53 = vand.u32 4294901760, %v1533_v40  ;;  %p1314_p8 = pnand %p1313_p7, %p1309_p2 }
  0x26   : > { %290 = vmatpush.msra.mxu0 %v1482_v19  ;;  %431 = vmatpush.msra.mxu2 %v1489_v22  ;;  %v348_v29 = vand.u32 4294901760, %v1489_v22  ;;  %v360_v30 = vand.u32 4294901760, %v1493_v23  ;;  %v354_v34 = vand.u32 4294901760, %v1501_v26  ;;  %v1564_v54 = vsub.f32 %v1459_v3, %v1521_v36 }
  0x27   : > { %489 = vmatpush.msra.mxu3 %v1482_v19  ;;  %v366_v35 = vand.u32 4294901760, %v1504_v27  ;;  %v373_v52 = vsub.f32 %v1498_v25, %v372_v39  ;;  %v379_v58 = vsub.f32 %v1513_v31, %v378_v47  ;;  %v390_v59 = vand.u32 4294901760, %v1553_v48 }
  0x28   : > { %292 = vmatpush.msra.mxu0 %v1476_v16  ;;  %434 = vmatpush.msra.mxu2 %v1501_v26  ;;  %v349_v37 = vsub.f32 %v1489_v22, %v348_v29  ;;  %v361_v38 = vsub.f32 %v1493_v23, %v360_v30  ;;  %v355_v41 = vsub.f32 %v1501_v26, %v354_v34  ;;  %v396_v4 = vand.u32 4294901760, %v1564_v54 }
  0x29   : > { %491 = vmatpush.msra.mxu3 %v1476_v16  ;;  %v367_v46 = vsub.f32 %v1504_v27, %v366_v35  ;;  %v1577_v60 = vsub.f32 %v1465_v6, %v1540_v42  ;;  %v374_v63 = vand.u32 4294901760, %v373_v52  ;;  %v385_v3 = vsub.f32 %v1533_v40, %v384_v53 }
  0x2a   : > { %294 = vmatpush.msra.mxu0 %v1484_v20  ;;  %v350_v45 = vand.u32 4294901760, %v349_v37  ;;  %437 = vmatpush.msra.mxu2 %v1493_v23  ;;  %v356_v49 = vand.u32 4294901760, %v355_v41  ;;  %v362_v51 = vand.u32 4294901760, %v361_v38  ;;  %v276_v6 = vsel %vm268_vm0, %v266_v56, 0 }
  0x2b   : > { %493 = vmatpush.msra.mxu3 %v1484_v20  ;;  %v368_v57 = vand.u32 4294901760, %v367_v46  ;;  %v380_v7 = vand.u32 4294901760, %v379_v58  ;;  %v391_v8 = vsub.f32 %v1553_v48, %v390_v59  ;;  %v402_v9 = vand.u32 4294901760, %v1577_v60 }
  0x2c   : > { %296 = vmatpush.msra.mxu0 %v1478_v17  ;;  %351 = vmatpush.msra.mxu1 %v350_v45  ;;  %v317_v11 = vand.u32 4294901760, %v316_v62  ;;  %v1598_v12 = vand.u32 4294901760, %v276_v6  ;;  %v386_v13 = vand.u32 4294901760, %v385_v3  ;;  %v397_v14 = vsub.f32 %v1564_v54, %v396_v4 }
  0x2d   : > { %440 = vmatpush.msra.mxu2 %v1504_v27  ;;  %495 = vmatpush.msra.mxu3 %v1478_v17  ;;  %v392_v33 = vand.u32 4294901760, %v391_v8  ;;  %v403_v37 = vsub.f32 %v1577_v60, %v402_v9  ;;  %v279_v45 = vsel %vm268_vm0, %v267_v21, 0 }
  0x2e   : > { %298 = vmatpush.msra.mxu0 %v1480_v18  ;;  %357 = vmatpush.msra.mxu1 %v356_v49  ;;  %v318_v38 = vsub.f32 %v316_v62, %v317_v11  ;;  %v324_v41 = vsub.f32 %v276_v6, %v1598_v12  ;;  %v398_v44 = vand.u32 4294901760, %v397_v14  ;;  %v331_v52 = vand.u32 4294901760, %v279_v45 }
  0x2f   : > { %443 = vmatpush.msra.mxu2 %v1498_v25  ;;  %497 = vmatpush.msra.mxu3 %v1480_v18  ;;  %v404_v46 = vand.u32 4294901760, %v403_v37 }
  0x30   : > { %300 = vmatpush.msra.mxu0 %v1495_v24  ;;  %363 = vmatpush.msra.mxu1 %v362_v51  ;;  %v319_v49 = vand.u32 4294901760, %v318_v38  ;;  %v325_v51 = vand.u32 4294901760, %v324_v41 }
  0x31   : > { %446 = vmatpush.msra.mxu2 %v1513_v31  ;;  %499 = vmatpush.msra.mxu3 %v1495_v24 }
  0x32   : > { %302 = vmatpush.msra.mxu0 %v1506_v28  ;;  %369 = vmatpush.msra.mxu1 %v368_v57  ;;  %v326_v56 = vsub.f32 %v324_v41, %v325_v51 }
  0x33   : > { %449 = vmatpush.msra.mxu2 %v1533_v40  ;;  %501 = vmatpush.msra.mxu3 %v1506_v28 }
  0x34   : > { %304 = vmatpush.msra.mxu0 %v1521_v36  ;;  %375 = vmatpush.msra.mxu1 %v374_v63  ;;  %v327_v22 = vand.u32 4294901760, %v326_v56 }
  0x35   : > { %452 = vmatpush.msra.mxu2 %v1553_v48  ;;  %503 = vmatpush.msra.mxu3 %v1521_v36 }
  0x36   : > { %306 = vmatpush.msra.mxu0 %v1540_v42  ;;  %381 = vmatpush.msra.mxu1 %v380_v7 }
  0x37   : > { %312 = vmatmul.f32.vlgmr.msra.gmra.mxu0 %v311_v10  ;;  %455 = vmatpush.msra.mxu2 %v1564_v54 }
  0x38   : > { %387 = vmatpush.msra.mxu1 %v386_v13  ;;  %505 = vmatpush.msra.mxu3 %v1540_v42 }
  0x39   : > { %458 = vmatpush.msra.mxu2 %v1577_v60  ;;  %509 = vmatmul.f32.vlgmr.msra.gmra.mxu3 %v309_v50  ;;  %v332_v50 = vsub.f32 %v279_v45, %v331_v52 }
  0x3a   : > { %393 = vmatpush.msra.mxu1 %v392_v33  ;;  %461 = vmatmul.f32.vlgmr.msra.gmra.mxu2 %v1543_v43 }
  0x3b   : > { %540 = vmatpush.msrb.mxu0 %v348_v29  ;;  %v333_v26 = vand.u32 4294901760, %v332_v50  ;;  %v641_v29 = vld [vmem:[%s1791_s3 + $0x20] sm:$0xff] }
  0x3c   : > { %399 = vmatpush.msra.mxu1 %v398_v44 }
  0x3d   : > { %544 = vmatpush.msrb.mxu0 %v354_v34  ;;  %v1693_v34 = vand.u32 4294901760, %v641_v29 }
  0x3e   : > { %405 = vmatpush.msra.mxu1 %v404_v46 }
  0x3f   : > { %320 = vmatmul.f32.gmra.mxu0 %v319_v49  ;;  %407 = vmatmul.f32.vlgmr.msra.gmra.mxu1 %v1515_v32 }
  0x40   : > { %601 = vmatpush.msrb.mxu1 %v1474_v15  ;;  %548 = vmatpush.msrb.mxu0 %v360_v30  ;;  %v334_v15 = vsub.f32 %v332_v50, %v333_v26 }
  0x41   : > { %515 = vmatmul.f32.gmra.mxu3 %v317_v11 }
  0x42   : > { %466 = vmatmul.f32.gmra.mxu2 %v316_v62  ;;  %603 = vmatpush.msrb.mxu1 %v1482_v19  ;;  %v335_v19 = vand.u32 4294901760, %v334_v15 }
  0x43   : > { %552 = vmatpush.msrb.mxu0 %v366_v35  ;;  %v640_v35 = vld [vmem:[%s1791_s3 + $0x18] sm:$0xff] }
  0x44   : > { %605 = vmatpush.msrb.mxu1 %v1476_v16  ;;  %v644_v16 = vld [vmem:[%s1791_s3 + $0x38] sm:$0xff]  ;;  %v1707_v43 = vand.u32 4294901760, %v640_v35 }
  0x45   : > { %556 = vmatpush.msrb.mxu0 %v372_v39 }
  0x46   : > { %607 = vmatpush.msrb.mxu1 %v1484_v20  ;;  %v747_v58 = vsub.f32 %v640_v35, %v1707_v43 }
  0x47   : > { %328 = vmatmul.f32.gmra.mxu0 %v327_v22  ;;  %411 = vmatmul.f32.gmra.mxu1 %v1568_v55 }
  0x48   : > { %609 = vmatpush.msrb.mxu1 %v1478_v17  ;;  %560 = vmatpush.msrb.mxu0 %v378_v47  ;;  %v1658_v17 = vand.u32 4294901760, %v644_v16  ;;  %v639_v47 = vld [vmem:[%s1791_s3 + $0x10] sm:$0xff]  ;;  %v748_v3 = vand.u32 4294901760, %v747_v58 }
  0x49   : > { %521 = vmatmul.f32.gmra.mxu3 %v325_v51 }
  0x4a   : > { %471 = vmatmul.f32.gmra.mxu2 %v324_v41  ;;  %611 = vmatpush.msrb.mxu1 %v1480_v18  ;;  %v643_v18 = vld [vmem:[%s1791_s3 + $0x30] sm:$0xff]  ;;  %v1665_v20 = vsub.f32 %v644_v16, %v1658_v17  ;;  %v749_v10 = vsub.f32 %v747_v58, %v748_v3 }
  0x4b   : > { %564 = vmatpush.msrb.mxu0 %v384_v53  ;;  %666 = vmatpush.msrb.mxu2 %v1658_v17  ;;  %v1667_v23 = vand.u32 4294901760, %v643_v18 }
  0x4c   : > { %613 = vmatpush.msrb.mxu1 %v1495_v24  ;;  %v642_v24 = vld [vmem:[%s1791_s3 + $0x28] sm:$0xff]  ;;  %v724_v25 = vand.u32 4294901760, %v1665_v20  ;;  %v750_v14 = vand.u32 4294901760, %v749_v10 }
  0x4d   : > { %568 = vmatpush.msrb.mxu0 %v390_v59  ;;  %668 = vmatpush.msrb.mxu2 %v1667_v23  ;;  %v1676_v27 = vsub.f32 %v643_v18, %v1667_v23  ;;  %v638_v59 = vld [vmem:[%s1791_s3 + $0x8] sm:$0xff] }
  0x4e   : > { %615 = vmatpush.msrb.mxu1 %v1506_v28  ;;  %v1678_v28 = vand.u32 4294901760, %v642_v24  ;;  %v725_v30 = vsub.f32 %v1665_v20, %v724_v25  ;;  %v677_v63 = vand.u32 4294901760, %v638_v59 }
  0x4f   : > { %336 = vmatmul.f32.gmra.mxu0 %v335_v19  ;;  %415 = vmatmul.f32.gmra.mxu1 %v1598_v12  ;;  %v730_v31 = vand.u32 4294901760, %v1676_v27 }
  0x50   : > { %572 = vmatpush.msrb.mxu0 %v396_v4  ;;  %617 = vmatpush.msrb.mxu1 %v1521_v36  ;;  %v726_v36 = vand.u32 4294901760, %v725_v30  ;;  %v637_v4 = vld [vmem:[%s1791_s3] sm:$0xff]  ;;  %v759_v8 = vsub.f32 %v638_v59, %v677_v63 }
  0x51   : > { %527 = vmatmul.f32.gmra.mxu3 %v333_v26  ;;  %670 = vmatpush.msrb.mxu2 %v1678_v28  ;;  %v731_v39 = vsub.f32 %v1676_v27, %v730_v31 }
  0x52   : > { %476 = vmatmul.f32.gmra.mxu2 %v332_v50  ;;  %576 = vmatpush.msrb.mxu0 %v402_v9  ;;  %v679_v9 = vand.u32 4294901760, %v637_v4 }
  0x53   : > { %619 = vmatpush.msrb.mxu1 %v1540_v42  ;;  %672 = vmatpush.msrb.mxu2 %v1693_v34  ;;  %v741_v42 = vsub.f32 %v641_v29, %v1693_v34  ;;  %v732_v48 = vand.u32 4294901760, %v731_v39 }
  0x54   : > { %797 = vmatpush.msra.mxu0 %v1665_v20  ;;  %727 = vmatpush.msrb.mxu3 %v726_v36  ;;  %v765_v13 = vsub.f32 %v637_v4, %v679_v9 }
  0x55   : > { %849 = vmatpush.msra.mxu1 %v1658_v17  ;;  %v742_v54 = vand.u32 4294901760, %v741_v42  ;;  %674 = vmatpush.msrb.mxu2 %v1707_v43 }
  0x56   : > { %800 = vmatpush.msra.mxu0 %v1676_v27  ;;  %733 = vmatpush.msrb.mxu3 %v732_v48  ;;  %v766_v37 = vand.u32 4294901760, %v765_v13 }
  0x57   : > { %419 = vmatmul.f32.gmra.mxu1 %v331_v52  ;;  %578 = vmatmul.f32.vlgmr.msrb.gmra.mxu0 %v1515_v32  ;;  %v743_v61 = vsub.f32 %v741_v42, %v742_v54 }
  0x58   : > { %851 = vmatpush.msra.mxu1 %v1667_v23  ;;  %v767_v45 = vsub.f32 %v765_v13, %v766_v37 }
  0x59   : > { %v744_v6 = vand.u32 4294901760, %v743_v61 }
  0x5a   : > { %853 = vmatpush.msra.mxu1 %v1678_v28  ;;  %v768_v46 = vand.u32 4294901760, %v767_v45 }
  0x5c   : > { %855 = vmatpush.msra.mxu1 %v1693_v34 }
  0x5e   : > { %857 = vmatpush.msra.mxu1 %v1707_v43 }
  0x5f   : > { %582 = vmatmul.f32.gmra.mxu0 %v1568_v55  ;;  %621 = vmatmul.f32.vlgmr.msrb.gmra.mxu1 %v1515_v32  ;;  %v1691_v32 = vsub.f32 %v642_v24, %v1678_v28 }
  0x61   : > { %v736_v40 = vand.u32 4294901760, %v1691_v32  ;;  %803 = vmatpush.msra.mxu0 %v1691_v32 }
  0x63   : > { %v737_v53 = vsub.f32 %v1691_v32, %v736_v40  ;;  %806 = vmatpush.msra.mxu0 %v741_v42 }
  0x65   : > { %v738_v60 = vand.u32 4294901760, %v737_v53  ;;  %809 = vmatpush.msra.mxu0 %v747_v58 }
  0x67   : > { %586 = vmatmul.f32.gmra.mxu0 %v1598_v12  ;;  %625 = vmatmul.f32.gmra.mxu1 %v1568_v55  ;;  %v1714_v55 = vand.u32 4294901760, %v639_v47 }
  0x68   : > { %739 = vmatpush.msrb.mxu3 %v738_v60 }
  0x69   : > { %v753_v62 = vsub.f32 %v639_v47, %v1714_v55  ;;  %676 = vmatpush.msrb.mxu2 %v1714_v55  ;;  %859 = vmatpush.msra.mxu1 %v1714_v55 }
  0x6a   : > { %745 = vmatpush.msrb.mxu3 %v744_v6 }
  0x6b   : > { %v754_v7 = vand.u32 4294901760, %v753_v62  ;;  %812 = vmatpush.msra.mxu0 %v753_v62  ;;  %678 = vmatpush.msrb.mxu2 %v677_v63 }
  0x6c   : > { %861 = vmatpush.msra.mxu1 %v677_v63  ;;  %751 = vmatpush.msrb.mxu3 %v750_v14 }
  0x6d   : > { %v755_v11 = vsub.f32 %v753_v62, %v754_v7  ;;  %815 = vmatpush.msra.mxu0 %v759_v8  ;;  %680 = vmatpush.msrb.mxu2 %v679_v9 }
  0x6e   : > { %863 = vmatpush.msra.mxu1 %v679_v9 }
  0x6f   : > { %590 = vmatmul.f32.gmra.mxu0 %v331_v52  ;;  %629 = vmatmul.f32.gmra.mxu1 %v1598_v12  ;;  %v760_v12 = vand.u32 4294901760, %v759_v8  ;;  %v756_v21 = vand.u32 4294901760, %v755_v11 }
  0x70   : > { %900 = vmatpush.msra.mxu2 %v724_v25  ;;  %818 = vmatpush.msra.mxu0 %v765_v13 }
  0x71   : > { %v761_v33 = vsub.f32 %v759_v8, %v760_v12  ;;  %757 = vmatpush.msrb.mxu3 %v756_v21 }
  0x72   : > { %904 = vmatpush.msra.mxu2 %v730_v31 }
  0x73   : > { %v762_v44 = vand.u32 4294901760, %v761_v33 }
  0x74   : > { %908 = vmatpush.msra.mxu2 %v736_v40 }
  0x75   : > { %763 = vmatpush.msrb.mxu3 %v762_v44 }
  0x76   : > { %912 = vmatpush.msra.mxu2 %v742_v54 }
  0x77   : > { %633 = vmatmul.f32.gmra.mxu1 %v331_v52  ;;  %769 = vmatpush.msrb.mxu3 %v768_v46 }
  0x78   : > { %916 = vmatpush.msra.mxu2 %v748_v3 }
  0x79   : > { %955 = vmatpush.msra.mxu3 %v1658_v17 }
  0x7a   : > { %920 = vmatpush.msra.mxu2 %v754_v7 }
  0x7b   : > { %957 = vmatpush.msra.mxu3 %v1667_v23 }
  0x7c   : > { %924 = vmatpush.msra.mxu2 %v760_v12 }
  0x7d   : > { %959 = vmatpush.msra.mxu3 %v1678_v28 }
  0x7e   : > { %928 = vmatpush.msra.mxu2 %v766_v37 }
  0x7f   : > { %961 = vmatpush.msra.mxu3 %v1693_v34 }
  0x81   : > { %963 = vmatpush.msra.mxu3 %v1707_v43 }
  0x83   : > { %965 = vmatpush.msra.mxu3 %v1714_v55 }
  0x85   : > { %967 = vmatpush.msra.mxu3 %v677_v63 }
  0x87   : > { %969 = vmatpush.msra.mxu3 %v679_v9 }
  0xb4   : > { %v1716_v57 = vpop.f32.mrf.mxu0 }
  0xbc   : > { %v321_v38 = vpop.f32.mrf.mxu0  ;;  %v408_v41 = vpop.f32.mrf.mxu1 }
  0xbd   : > { %v462_v52 = vpop.f32.mrf.mxu2  ;;  %v510_v22 = vpop.f32.mrf.mxu3  ;;  %v409_v26 = vadd.f32 %v408_v41, %v1716_v57 }
  0xbf   : > { %v463_v16 = vadd.f32 %v462_v52, %v409_v26 }
  0xc1   : > { %v511_v18 = vadd.f32 %v510_v22, %v463_v16 }
  0xc4   : > { %v329_v49 = vpop.f32.mrf.mxu0  ;;  %v412_v51 = vpop.f32.mrf.mxu1 }
  0xc5   : > { %v467_v17 = vpop.f32.mrf.mxu2  ;;  %v413_v20 = vadd.f32 %v412_v51, %v321_v38  ;;  %v516_v23 = vpop.f32.mrf.mxu3 }
  0xc7   : > { %v468_v28 = vadd.f32 %v467_v17, %v413_v20 }
  0xc9   : > { %v517_v34 = vadd.f32 %v516_v23, %v468_v28 }
  0xcc   : > { %v337_v56 = vpop.f32.mrf.mxu0  ;;  %v416_v50 = vpop.f32.mrf.mxu1 }
  0xcd   : > { %v472_v31 = vpop.f32.mrf.mxu2  ;;  %v417_v35 = vadd.f32 %v416_v50, %v329_v49  ;;  %v522_v40 = vpop.f32.mrf.mxu3 }
  0xcf   : > { %v473_v47 = vadd.f32 %v472_v31, %v417_v35 }
  0xd1   : > { %v523_v59 = vadd.f32 %v522_v40, %v473_v47 }
  0xd4   : > { %v420_v15 = vpop.f32.mrf.mxu1  ;;  %v579_v19 = vpop.f32.mrf.mxu0 }
  0xd5   : > { %v580_v24 = vadd.f32 %v579_v19, %v511_v18  ;;  %v421_v60 = vadd.f32 %v420_v15, %v337_v56  ;;  %v477_v61 = vpop.f32.mrf.mxu2  ;;  %v528_v8 = vpop.f32.mrf.mxu3 }
  0xd7   : > { %v478_v6 = vadd.f32 %v477_v61, %v421_v60 }
  0xd9   : > { %v529_v14 = vadd.f32 %v528_v8, %v478_v6 }
  0xdc   : > { %v583_v25 = vpop.f32.mrf.mxu0  ;;  %v622_v27 = vpop.f32.mrf.mxu1 }
  0xdd   : > { %v623_v29 = vadd.f32 %v622_v27, %v580_v24  ;;  %v584_v39 = vadd.f32 %v583_v25, %v517_v34  ;;  %v238_v34 = vsub.f32 %v1452_v0, %v1454_v1 }
  0xdf   : > { %v646_v30 = vsel %vm241_vm1, %v623_v29, 0  ;;  %v240_v40 = vmul.f32 %v238_v34, %v238_v34 }
  0xe0   : > { %v681_v32 = vand.u32 4294901760, %v646_v30 }
  0xe2   : > { %v682_v36 = vsub.f32 %v646_v30, %v681_v32  ;;  %771 = vmatmul.f32.vlgmr.msrb.gmra.mxu3 %v681_v32 }
  0xe4   : > { %v626_v42 = vpop.f32.mrf.mxu1  ;;  %821 = vmatmul.f32.vlgmr.msra.gmra.mxu0 %v682_v36  ;;  %v683_v43 = vand.u32 4294901760, %v682_v36  ;;  %v587_v53 = vpop.f32.mrf.mxu0 }
  0xe5   : > { %v627_v48 = vadd.f32 %v626_v42, %v584_v39  ;;  %v588_v63 = vadd.f32 %v587_v53, %v523_v59 }
  0xe6   : > { %867 = vmatmul.f32.vlgmr.msra.gmra.mxu1 %v683_v43  ;;  %v684_v54 = vsub.f32 %v682_v36, %v683_v43 }
  0xe7   : > { %v649_v55 = vsel %vm241_vm1, %v627_v48, 0  ;;  %v243_v48 = vsel %vm241_vm1, %v240_v40, 0.0 }
  0xe8   : > { %v689_v57 = vand.u32 4294901760, %v649_v55  ;;  %v685_v58 = vand.u32 4294901760, %v684_v54 }
  0xea   : > { %v690_v62 = vsub.f32 %v649_v55, %v689_v57  ;;  %686 = vmatmul.f32.vlgmr.msrb.gmra.mxu2 %v685_v58  ;;  %775 = vmatmul.f32.gmra.mxu3 %v689_v57 }
  0xec   : > { %v630_v3 = vpop.f32.mrf.mxu1  ;;  %826 = vmatmul.f32.gmra.mxu0 %v690_v62  ;;  %v691_v4 = vand.u32 4294901760, %v690_v62  ;;  %v591_v11 = vpop.f32.mrf.mxu0 }
  0xed   : > { %v631_v7 = vadd.f32 %v630_v3, %v588_v63  ;;  %v592_v33 = vadd.f32 %v591_v11, %v529_v14 }
  0xee   : > { %873 = vmatmul.f32.gmra.mxu1 %v691_v4  ;;  %v692_v9 = vsub.f32 %v690_v62, %v691_v4 }
  0xef   : > { %v652_v10 = vsel %vm241_vm1, %v631_v7, 0 }
  0xf0   : > { %v697_v12 = vand.u32 4294901760, %v652_v10  ;;  %v693_v13 = vand.u32 4294901760, %v692_v9 }
  0xf2   : > { %v698_v21 = vsub.f32 %v652_v10, %v697_v12  ;;  %694 = vmatmul.f32.gmra.mxu2 %v693_v13  ;;  %779 = vmatmul.f32.gmra.mxu3 %v697_v12 }
  0xf4   : > { %v634_v37 = vpop.f32.mrf.mxu1  ;;  %831 = vmatmul.f32.gmra.mxu0 %v698_v21  ;;  %v699_v38 = vand.u32 4294901760, %v698_v21 }
  0xf5   : > { %v635_v41 = vadd.f32 %v634_v37, %v592_v33 }
  0xf6   : > { %879 = vmatmul.f32.gmra.mxu1 %v699_v38  ;;  %v700_v44 = vsub.f32 %v698_v21, %v699_v38 }
  0xf7   : > { %v655_v45 = vsel %vm241_vm1, %v635_v41, 0 }
  0xf8   : > { %v705_v46 = vand.u32 4294901760, %v655_v45  ;;  %v701_v49 = vand.u32 4294901760, %v700_v44 }
  0xfa   : > { %v706_v51 = vsub.f32 %v655_v45, %v705_v46  ;;  %702 = vmatmul.f32.gmra.mxu2 %v701_v49  ;;  %783 = vmatmul.f32.gmra.mxu3 %v705_v46 }
  0xfc   : > { %836 = vmatmul.f32.gmra.mxu0 %v706_v51  ;;  %v707_v52 = vand.u32 4294901760, %v706_v51 }
  0xfe   : > { %885 = vmatmul.f32.gmra.mxu1 %v707_v52  ;;  %v708_v56 = vsub.f32 %v706_v51, %v707_v52 }
 0x100   : > { %v709_v50 = vand.u32 4294901760, %v708_v56 }
 0x102   : > { %710 = vmatmul.f32.gmra.mxu2 %v709_v50  ;;  %971 = vmatmul.f32.vlgmr.msra.gmra.mxu3 %v681_v32 }
 0x10a   : > { %930 = vmatmul.f32.vlgmr.msra.gmra.mxu2 %v681_v32  ;;  %975 = vmatmul.f32.gmra.mxu3 %v689_v57  ;;  %v237_v32 = vsub.f32 %v1456_v2, %v1462_v5 }
 0x10c   : > { %v239_v39 = vmul.f32 %v237_v32, %v237_v32 }
 0x10e   : > { %v242_v47 = vsel %vm241_vm1, %v239_v39, 0.0 }
 0x10f   : > { %v244_v55 = vadd.f32 %v243_v48, %v242_v47 }
 0x111   : > { %245 = vadd.xlane.f32.xlu0 %v244_v55 }
 0x112   : > { %934 = vmatmul.f32.gmra.mxu2 %v689_v57  ;;  %979 = vmatmul.f32.gmra.mxu3 %v697_v12 }
 0x11a   : > { %938 = vmatmul.f32.gmra.mxu2 %v697_v12  ;;  %983 = vmatmul.f32.gmra.mxu3 %v705_v46 }
 0x122   : > { %942 = vmatmul.f32.gmra.mxu2 %v705_v46 }
 0x161   : > { %v822_v20 = vpop.f32.mrf.mxu0 }
 0x163   : > { %v868_v24 = vpop.f32.mrf.mxu1 }
 0x165   : > { %v772_v22 = vpop.f32.mrf.mxu3 }
 0x169   : > { %v827_v30 = vpop.f32.mrf.mxu0 }
 0x16b   : > { %v874_v42 = vpop.f32.mrf.mxu1 }
 0x16d   : > { %v687_v26 = vpop.f32.mrf.mxu2  ;;  %v776_v15 = vpop.f32.mrf.mxu3 }
 0x16e   : > { %v773_v25 = vadd.f32 %v772_v22, %v687_v26 }
 0x170   : > { %v823_v28 = vadd.f32 %v822_v20, %v773_v25 }
 0x171   : > { %v832_v5 = vpop.f32.mrf.mxu0 }
 0x172   : > { %v869_v36 = vadd.f32 %v868_v24, %v823_v28 }
 0x173   : > { %v880_v63 = vpop.f32.mrf.mxu1 }
 0x175   : > { %v695_v19 = vpop.f32.mrf.mxu2  ;;  %v780_v16 = vpop.f32.mrf.mxu3 }
 0x176   : > { %v777_v29 = vadd.f32 %v776_v15, %v695_v19 }
 0x178   : > { %v828_v35 = vadd.f32 %v827_v30, %v777_v29 }
 0x179   : > { %v837_v37 = vpop.f32.mrf.mxu0 }
 0x17a   : > { %v875_v54 = vadd.f32 %v874_v42, %v828_v35 }
 0x17b   : > { %v886_v50 = vpop.f32.mrf.mxu1 }
 0x17d   : > { %v703_v17 = vpop.f32.mrf.mxu2  ;;  %v784_v18 = vpop.f32.mrf.mxu3 }
 0x17e   : > { %v781_v53 = vadd.f32 %v780_v16, %v703_v17 }
 0x180   : > { %v833_v0 = vadd.f32 %v832_v5, %v781_v53 }
 0x182   : > { %v881_v6 = vadd.f32 %v880_v63, %v833_v0 }
 0x184   : > { %v246_v63 = vpop.xlane.xlu0 %245 }
 0x185   : > { %v711_v23 = vpop.f32.mrf.mxu2  ;;  %v972_v27 = vpop.f32.mrf.mxu3 }
 0x186   : > { %v785_v11 = vadd.f32 %v784_v18, %v711_v23 }
 0x188   : > { %v838_v44 = vadd.f32 %v837_v37, %v785_v11  ;;  %v1073_v37 = vlaneseq }
 0x18a   : > { %v887_v16 = vadd.f32 %v886_v50, %v838_v44 }
 0x18d   : > { %v931_v31 = vpop.f32.mrf.mxu2  ;;  %v976_v57 = vpop.f32.mrf.mxu3 }
 0x18e   : > { %v932_v43 = vadd.f32 %v931_v31, %v869_v36 }
 0x190   : > { %v973_v59 = vadd.f32 %v972_v27, %v932_v43 }
 0x192   : > { %v1009_v60 = vadd.f32 0.5, %v973_v59  ;;  %v987_v3 = vmul.f32 %v973_v59, %v973_v59  ;;  %v1003_v24 = vrot.slane %v973_v59, 6 }
 0x194   : > { %v1018_v10 = vmul.f32 %v1009_v60, %v1009_v60  ;;  %v989_v13 = vrot.slane %v987_v3, 4  ;;  %v1013_v34 = vrot.slane %v1009_v60, 6  ;;  %v247_v3 = vrot.slane %v246_v63, 4 }
 0x195   : > { %v935_v58 = vpop.f32.mrf.mxu2  ;;  %v980_v12 = vpop.f32.mrf.mxu3 }
 0x196   : > { %v936_v2 = vadd.f32 %v935_v58, %v875_v54  ;;  %v1027_v41 = vrot.slane %v1018_v10, 6 }
 0x198   : > { %v977_v1 = vadd.f32 %v976_v57, %v936_v2 }
 0x19a   : > { %v1010_v61 = vadd.f32 0.5, %v977_v1  ;;  %v993_v62 = vmul.f32 %v977_v1, %v977_v1  ;;  %v991_v45 = vsub.f32 %v977_v1, %v989_v13  ;;  %v1004_v17 = vrot.slane %v977_v1, 6 }
 0x19c   : > { %v1019_v4 = vmul.f32 %v1010_v61, %v1010_v61  ;;  %v996_v8 = vrot.slane %v993_v62, 4  ;;  %v1014_v28 = vrot.slane %v1010_v61, 6  ;;  %v1005_v30 = vsel %vm1002_vm3, %v1003_v24, %v1004_v17 }
 0x19d   : > { %v939_v7 = vpop.f32.mrf.mxu2  ;;  %v984_v29 = vpop.f32.mrf.mxu3  ;;  %v1007_v35 = vmul.f32 %v1005_v30, %v973_v59 }
 0x19e   : > { %v940_v9 = vadd.f32 %v939_v7, %v881_v6  ;;  %v1028_v14 = vrot.slane %v1019_v4, 6  ;;  %v997_v33 = vsel %vm995_vm2, %v989_v13, %v996_v8  ;;  %v1015_v36 = vsel %vm1002_vm3, %v1013_v34, %v1014_v28 }
 0x19f   : > { %v1017_v40 = vmul.f32 %v1015_v36, %v1009_v60  ;;  %v248_v4 = vadd.f32 %v247_v3, %v246_v63 }
 0x1a0   : > { %v981_v21 = vadd.f32 %v980_v12, %v940_v9  ;;  %v1029_v51 = vsel %vm1002_vm3, %v1027_v41, %v1028_v14 }
 0x1a1   : > { %v1031_v26 = vadd.f32 %v1029_v51, %v1018_v10  ;;  %v1020_v48 = vmul.f32 2.0, %v1017_v40  ;;  %v249_v6 = vrot.slane %v248_v4, 2 }
 0x1a2   : > { %v999_v38 = vsub.f32 %v981_v21, %v997_v33  ;;  %v992_v46 = vsub.f32 %v981_v21, %v989_v13 }
 0x1a3   : > { %v1032_v25 = vadd.f32 0.0001, %v1031_v26  ;;  %v1021_v2 = vadd.f32 0.0001, %v1020_v48  ;;  %v250_v7 = vadd.f32 %v249_v6, %v248_v4 }
 0x1a4   : > { %v1034_v49 = vrot.slane %v999_v38, 6  ;;  %v1074_v38 = vshrl.u32 %v1073_v37, 7 }
 0x1a5   : > { %v943_v22 = vpop.f32.mrf.mxu2  ;;  %v251_v8 = vrot.slane %v250_v7, 1 }
 0x1a6   : > { %v1036_v52 = vadd.f32 %v1034_v49, %v991_v45  ;;  %v1037_v56 = vadd.f32 %v1034_v49, %v992_v46  ;;  %v944_v23 = vadd.f32 %v943_v22, %v887_v16  ;;  %vm1078_vm9 = vcmp.eq.s32.totalorder %v1074_v38, 1 }
 0x1a7   : > { %v252_v9 = vadd.f32 %v251_v8, %v250_v7  ;;  %vm1077_vm10 = vcmp.eq.s32.totalorder %v1074_v38, 0 }
 0x1a8   : > { %v1038_v15 = vadd.f32 0.0009, %v1036_v52  ;;  %v1039_v19 = vadd.f32 0.0009, %v1037_v56  ;;  %v985_v32 = vadd.f32 %v984_v29, %v944_v23 }
 0x1a9   : > { %1202 = vpush %v252_v9 }
 0x1aa   : > { %v1042_v18 = vrot.slane %v1038_v15, 4  ;;  %v1043_v20 = vrot.slane %v1039_v19, 4  ;;  %v1008_v39 = vsub.f32 %v985_v32, %v1007_v35 }
 0x1ac   : > { %v1044_v27 = vsel %vm995_vm2, %v1042_v18, %v1043_v20  ;;  %v1022_v43 = vmul.f32 2.0, %v1008_v39 }
 0x1ad   : > { %v1046_v31 = vmul.f32 %v1044_v27, %v1032_v25 }
 0x1ae   : > { %v1023_v55 = vadd.f32 0.0009, %v1022_v43 }
 0x1af   : > { %1258 = vrcp.f32 %v1046_v31  ;;  %v1058_v54 = vand.u32 2147483648, %v1046_v31  ;;  %v1056_v58 = vand.u32 2147483647, %v1046_v31  ;;  %vm1052_vm5 = vweird.f32 %v1046_v31 }
 0x1b0   : > { %v1024_v59 = vmul.f32 %v1023_v55, %v1021_v2 }
 0x1b1   : > { %v1059_v0 = vor.u32 1.1754944e-38, %v1058_v54  ;;  %vm1057_vm7 = vcmp.eq.f32.partialorder %v1056_v58, 8.507059e+37 }
 0x1b5   : > { %v1259_v42 = vpop.eup %1258 }
 0x1b6   : > { %v1048_v47 = vmul.f32 %v1259_v42, %v1046_v31  ;;  %vm1053_vm4 = vweird.f32 %v1259_v42 }
 0x1b7   : > { %vm1054_vm6 = vmor %vm1052_vm5, %vm1053_vm4 }
 0x1b8   : > { %v1049_v53 = vsub.f32 1.0, %v1048_v47 }
 0x1ba   : > { %v1050_v57 = vmul.f32 %v1259_v42, %v1049_v53 }
 0x1bc   : > { %v1051_v5 = vadd.f32 %v1259_v42, %v1050_v57 }
 0x1be   : > { %v1055_v1 = vsel %vm1054_vm6, %v1259_v42, %v1051_v5 }
 0x1bf   : > { %v1060_v61 = vsel %vm1057_vm7, %v1059_v0, %v1055_v1 }
 0x1c0   : > { %v1061_v60 = vmul.f32 %v1060_v61, %v1024_v59 }
 0x1c2   : > { %v1063_v62 = vsel %vm1062_vm8, %v1061_v60, 0.0 }
 0x1c3   : > { %1064 = vadd.xlane.f32.xlu0 %v1063_v62 }
 0x1da   : > { %s1203_s6 = spop %1202 }
 0x1db   : > { %v1075_v44 = vstv %s1203_s6 }
 0x236   : > { %v1065_v10 = vpop.xlane.xlu0 %1064 }
 0x237   : > { %v1066_v11 = vrot.slane %v1065_v10, 4 }
 0x239   : > { %v1067_v12 = vadd.f32 %v1066_v11, %v1065_v10 }
 0x23b   : > { %v1068_v13 = vrot.slane %v1067_v12, 2 }
 0x23d   : > { %v1069_v14 = vadd.f32 %v1068_v13, %v1067_v12 }
 0x23f   : > { %v1070_v21 = vrot.slane %v1069_v14, 1 }
 0x241   : > { %v1071_v33 = vadd.f32 %v1070_v21, %v1069_v14 }
 0x243   : > { %1204 = vpush %v1071_v33 }
 0x274   : > { %s1205_s8 = spop %1204 }
 0x275   : > { %v1076_v41 = vstv %s1205_s8 }
 0x276   : > { %v1079_v45 = vsel %vm1078_vm9, %v1076_v41, 0.0 }
 0x277   : > { %v1080_v46 = vsel %vm1077_vm10, %v1075_v44, %v1079_v45 }
 0x278   : > { %1081 = vst [vmem:[%s222_s30] sm:$0xff] %v1080_v46 }
 0x279   : > { %1317 = shalt.err (!%p1314_p8)
}
 0x27a   : > { %1210 = dma.vmem_to_hbm [thread:$0]  (%p1424_p5), %s1096_s5, 128, %s1098_s7, %s1083_s19  }
 0x27b PF: > { %p1222_p9 = scmp.ge.s32.totalorder %s1356_s18, 2  ;;  %s1109_s20 = sand.u32 1, %s1344_s15  }
 0x27c   : > { %s1110_s23 = scalar_lea.sflag [#allocation4], %s1109_s20 }
 0x27d   : > { %p1217_p10 = pnand %p1222_p9, %p1428_p6 }
 0x27f   : > { %p1218_p11 = pneg %p1217_p10 }
 0x281   : > { %1339 = dma.done.wait (%p1218_p11), %s1110_s23, 128  }
 0x282   : > { %1341 = vsyncadd (%p1218_p11), %s1110_s23, 4294967168  ;;  %p15_p12 = scmp.ge.s32.totalorder %s1411_s21, 4   ;;  %s1795_s15 = smov %s1348_s16 }
 0x283   : > { %s1796_s16 = smov %s1352_s17  ;;  %s1797_s17 = smov %s1422_s24 }
 0x284   : > { %s1798_s18 = smov %s1411_s21  ;;  %17 = sbr.rel (!%p15_p12) target bundleno = 4 (0x4), region = 79 }
 0x289   :  { %1116 = vsyncpa [#allocation3], 1 }
 0x28a   :  { %1118 = vsyncpa [#allocation3 + $0x1], 1 }
 0x28b   :  { %1119 = vsyncpa [#allocation4], 1 }
 0x28c   :  { %1121 = vsyncpa [#allocation4 + $0x1], 1 }

</bundles_post_ra>
